<compile_context>
chip_gen: v5e
topology: v5e:2x2
jax: 0.10.0
libtpu: 0.0.40
codegen_flags: <defaults>
</compile_context>

<pallas_src>
import functools

import jax
import jax.numpy as jnp
import numpy as np
from jax.experimental import pallas as pl
from jax.experimental.pallas import tpu as pltpu


def _round_up(n, m):
    return ((n + m - 1) // m) * m


def _conv_bn_act_kernel(x_ref, w_ref, mask_ref, bias_ref, o_ref,
                        *, W, K, P, HWp, apply_relu):
    """One batch element: KxK stride-1 conv + folded BN (+ ReLU) as ONE fused matmul.

    x_ref:    (1, C_in, Lp)      f32, row-zero-padded, flattened, lane-padded input
    w_ref:    (C_out, K*K*C_in)  bf16, BN-scale-folded weights; contraction index
                                 ordered (kj, ki, ci) to match the in-kernel stack
    mask_ref: (K, 1, Lp)         f32 column-boundary mask per kj (kj == P is all-ones)
    bias_ref: (C_out, 1)         f32 folded bias = beta + (conv_bias - mean) * scale
    o_ref:    (1, C_out, HWp)
    """
    x = x_ref[0]                                   # (C_in, Lp)
    Lp = x.shape[1]

    # Build the im2col stack (K*K*C_in, HWp): one lane roll + (at most) one column-mask
    # multiply per kj, plus one further roll per row tap ki != 0. Row boundaries need no
    # mask because the rows were zero-padded on the host, and the column mask commutes
    # with the row roll (it depends only on the lane's column index).
    taps = []
    for kj in range(K):
        dw = kj - P
        y = x if dw == 0 else pltpu.roll(x, (-dw) % Lp, axis=1)
        if dw != 0:                                # kj == P mask is all-ones -> skip
            y = y * mask_ref[kj]
        for ki in range(K):
            s = ki * W                             # row offset is a pure flat shift
            t = y if s == 0 else pltpu.roll(y, (-s) % Lp, axis=1)
            taps.append(t[:, :HWp])                # aligned prefix slice (HWp % 128 == 0)
    stack = taps[0] if len(taps) == 1 else jnp.concatenate(taps, axis=0)

    # Single deep MXU contraction: bf16 x bf16 operands, f32 accumulation.
    acc = jnp.dot(w_ref[...], stack.astype(w_ref.dtype),
                  preferred_element_type=jnp.float32)        # (C_out, HWp)

    out = acc + bias_ref[...]                      # folded BN shift + conv bias
    if apply_relu:
        out = jnp.maximum(out, 0.0)
    o_ref[0] = out.astype(o_ref.dtype)


def conv_bn_relu(x, conv_w, conv_b, gamma, beta, running_mean, running_var,
                 *, stride=1, padding=0, dilation=1, groups=1, eps=1e-5, act='relu'):
    """x: (N, C_in, H, W) NCHW; conv_w: (C_out, C_in, K, K) OIHW; conv_b: (C_out,)."""
    assert stride == 1 and dilation == 1 and groups == 1, \
        "kernel supports stride=1, dilation=1, groups=1"
    N, C_in, H, W = x.shape
    C_out, C_in_w, KH, KW = conv_w.shape
    assert C_in_w == C_in and KH == KW
    K, P = KH, padding
    assert 2 * P <= K - 1, "over-padded conv (2*padding > kernel_size-1) not supported"
    H_out = H + 2 * P - K + 1
    W_out = W + 2 * P - K + 1
    Hr = H + 2 * P                         # rows after host zero-padding
    HW = H * W
    HWp = _round_up(HW, 128)               # lane-dense computed-output width
    Lp = _round_up(Hr * W, 128)            # lane-dense padded-input width (>= HWp)

    # ---- host-side layout prep (cheap, outside the hot loop) -------------------
    # zero-pad rows (row taps then never need a boundary mask), flatten, lane-pad.
    xr = jnp.pad(x, ((0, 0), (0, 0), (P, P), (0, 0))).reshape(N, C_in, Hr * W)
    if Lp > Hr * W:
        xr = jnp.pad(xr, ((0, 0), (0, 0), (0, Lp - Hr * W)))
    x_flat = xr.astype(jnp.float32)

    # Fold BN scale into the conv weights; conv bias + BN shift into one f32 bias.
    scale = (gamma / jnp.sqrt(running_var + eps)).astype(jnp.float32)
    w_scaled = conv_w.astype(jnp.float32) * scale[:, None, None, None]
    bias2 = (beta + (conv_b - running_mean) * scale).astype(jnp.float32).reshape(C_out, 1)
    # (co,ci,ki,kj) -> (co,kj,ki,ci) -> (C_out, K*K*C_in): matches the kernel's stacking
    # order (kj outer, ki inner, ci fastest). Cast to bf16 for the MXU.
    w2 = (jnp.transpose(w_scaled, (0, 3, 2, 1))
             .reshape(C_out, K * K * C_in).astype(jnp.bfloat16))

    # Column-boundary masks, one per kj: mask[kj, 0, q] = 1 iff the source column
    # (q mod W) + (kj - P) lies inside [0, W). Row boundaries are handled by the host
    # zero-padding, so the masks depend on kj only (kj == P is all-ones -> skipped).
    col = np.arange(Lp) % W
    masks_np = np.zeros((K, 1, Lp), np.float32)
    for kj in range(K):
        dw = kj - P
        masks_np[kj, 0, :] = ((col + dw >= 0) & (col + dw < W)).astype(np.float32)
    masks = jnp.asarray(masks_np)

    kernel = functools.partial(_conv_bn_act_kernel, W=W, K=K, P=P, HWp=HWp,
                               apply_relu=(act == 'relu'))

    out_flat = pl.pallas_call(
        kernel,
        out_shape=jax.ShapeDtypeStruct((N, C_out, HWp), x.dtype),
        grid=(N,),
        in_specs=[
            pl.BlockSpec((1, C_in, Lp), lambda n: (n, 0, 0)),          # x (per image)
            pl.BlockSpec((C_out, K * K * C_in), lambda n: (0, 0)),     # folded weights
            pl.BlockSpec((K, 1, Lp), lambda n: (0, 0, 0)),             # column masks
            pl.BlockSpec((C_out, 1), lambda n: (0, 0)),                # folded bias
        ],
        out_specs=pl.BlockSpec((1, C_out, HWp), lambda n: (n, 0, 0)),
        compiler_params=pltpu.CompilerParams(
            dimension_semantics=("parallel",),
            # headroom for larger feature maps; safe on v5e/v6e/v7x physical VMEM
            vmem_limit_bytes=48 * 1024 * 1024),
    )(x_flat, w2, masks, bias2)

    out = out_flat[:, :, :HW].reshape(N, C_out, H, W)
    return out[:, :, :H_out, :W_out]


def ref_forward(x, conv_w, conv_b, gamma, beta, running_mean, running_var,
                *, padding=0, eps=1e-5, act='relu'):
    """Pure-JAX reference: Conv2d(+bias) -> BatchNorm2d (eval) -> ReLU."""
    y = jax.lax.conv_general_dilated(
        x, conv_w, window_strides=(1, 1),
        padding=((padding, padding), (padding, padding)),
        dimension_numbers=("NCHW", "OIHW", "NCHW"),
        precision=jax.lax.Precision.HIGHEST)
    y = y + conv_b[None, :, None, None]
    inv = 1.0 / jnp.sqrt(running_var + eps)
    y = (y - running_mean[None, :, None, None]) * (gamma * inv)[None, :, None, None] \
        + beta[None, :, None, None]
    if act == 'relu':
        y = jnp.maximum(y, 0.0)
    return y


if __name__ == "__main__":
    key = jax.random.PRNGKey(0)
    kx, kw, kb, kg, kbe, km, kv, kw1, kb1 = jax.random.split(key, 9)

    # small shapes consistent with the module: ConvBNReLU(8, 16, 3, padding=1)
    N, C_in, C_out, H, W = 2, 8, 16, 16, 16
    K, P = 3, 1

    x = jax.random.normal(kx, (N, C_in, H, W), dtype=jnp.float32)

    # deterministic synthetic init mimicking nn.Conv2d(8, 16, 3, padding=1)
    fan_in = C_in * K * K
    bound = float(1.0 / np.sqrt(fan_in))
    conv_w = jax.random.uniform(kw, (C_out, C_in, K, K), jnp.float32, -bound, bound)
    conv_b = jax.random.uniform(kb, (C_out,), jnp.float32, -bound, bound)

    # non-trivial BN parameters / running stats so the folded path is exercised
    gamma = jax.random.uniform(kg, (C_out,), jnp.float32, 0.5, 1.5)
    beta = 0.1 * jax.random.normal(kbe, (C_out,), dtype=jnp.float32)
    running_mean = 0.1 * jax.random.normal(km, (C_out,), dtype=jnp.float32)
    running_var = jax.random.uniform(kv, (C_out,), jnp.float32, 0.5, 1.5)

    # --- 3x3 / padding=1 / ReLU path -------------------------------------------
    out = conv_bn_relu(x, conv_w, conv_b, gamma, beta, running_mean, running_var,
                       padding=P, act='relu')
    out = jax.block_until_ready(out)
    expected = ref_forward(x, conv_w, conv_b, gamma, beta, running_mean, running_var,
                           padding=P, act='relu')
    assert out.shape == (N, C_out, H, W)
    # tolerance accounts for bf16 MXU operands (per perf review): error ~ sqrt(72) bf16
    # ulps on O(1) outputs; masks/padding/bias stay exact (f32).
    err = float(jnp.max(jnp.abs(out - expected)))
    assert jnp.allclose(out, expected, atol=2.5e-2, rtol=1e-2), err

    # --- 1x1 / padding=0 / act=None path (ConvBNReLU with act=None) ------------
    bound1 = float(1.0 / np.sqrt(C_in))
    conv_w1 = jax.random.uniform(kw1, (C_out, C_in, 1, 1), jnp.float32, -bound1, bound1)
    conv_b1 = jax.random.uniform(kb1, (C_out,), jnp.float32, -bound1, bound1)
    out1 = conv_bn_relu(x, conv_w1, conv_b1, gamma, beta, running_mean, running_var,
                        padding=0, act=None)
    out1 = jax.block_until_ready(out1)
    expected1 = ref_forward(x, conv_w1, conv_b1, gamma, beta, running_mean, running_var,
                            padding=0, act=None)
    assert out1.shape == (N, C_out, H, W)
    err1 = float(jnp.max(jnp.abs(out1 - expected1)))
    assert jnp.allclose(out1, expected1, atol=2.5e-2, rtol=1e-2), err1

    print("KERNEL_OK")
</pallas_src>

<mosaic_0001>
module attributes {stable_mosaic.version = 11 : i64} {
  func.func @_conv_bn_act_kernel(%arg0: i32, %arg1: memref<1x8x384xf32, #tpu.memory_space<vmem>>, %arg2: memref<16x72xbf16, #tpu.memory_space<vmem>>, %arg3: memref<3x1x384xf32, #tpu.memory_space<vmem>>, %arg4: memref<16x1xf32, #tpu.memory_space<vmem>>, %arg5: memref<1x16x256xf32, #tpu.memory_space<vmem>>) attributes {dimension_semantics = [#tpu.dimension_semantics<parallel>], iteration_bounds = array<i64: 2>, scalar_prefetch = 0 : i64, scratch_operands = 0 : i64, tpu.core_type = #tpu.core_type<tc>, window_params = [{transform_indices = @transform_0, window_bounds = array<i64: 1, 8, 384>}, {pipeline_mode = #tpu.pipeline_mode<synchronous>, transform_indices = @transform_1, window_bounds = array<i64: 16, 72>}, {pipeline_mode = #tpu.pipeline_mode<synchronous>, transform_indices = @transform_2, window_bounds = array<i64: 3, 1, 384>}, {pipeline_mode = #tpu.pipeline_mode<synchronous>, transform_indices = @transform_3, window_bounds = array<i64: 16, 1>}, {transform_indices = @transform_4, window_bounds = array<i64: 1, 16, 256>}]} {
    %c0 = arith.constant 0 : index
    %c0_0 = arith.constant 0 : index
    %c0_1 = arith.constant 0 : index
    %0 = vector.load %arg1[%c0, %c0_0, %c0_1] : memref<1x8x384xf32, #tpu.memory_space<vmem>>, vector<1x8x384xf32>
    %1 = vector.shape_cast %0 : vector<1x8x384xf32> to vector<8x384xf32>
    %c1_i32 = arith.constant 1 : i32
    %2 = tpu.dynamic_rotate %1 by %c1_i32 dim 1 : vector<8x384xf32>, i32 -> vector<8x384xf32>
    %c0_2 = arith.constant 0 : index
    %c0_3 = arith.constant 0 : index
    %c0_4 = arith.constant 0 : index
    %3 = vector.load %arg3[%c0_2, %c0_3, %c0_4] : memref<3x1x384xf32, #tpu.memory_space<vmem>>, vector<1x1x384xf32>
    %4 = vector.shape_cast %3 : vector<1x1x384xf32> to vector<1x384xf32>
    %5 = vector.broadcast %4 : vector<1x384xf32> to vector<8x384xf32>
    %6 = arith.mulf %2, %5 : vector<8x384xf32>
    %7 = vector.extract_strided_slice %6 {offsets = [0, 0], sizes = [8, 256], strides = [1, 1]} : vector<8x384xf32> to vector<8x256xf32>
    %c368_i32 = arith.constant 368 : i32
    %8 = tpu.dynamic_rotate %6 by %c368_i32 dim 1 : vector<8x384xf32>, i32 -> vector<8x384xf32>
    %9 = vector.extract_strided_slice %8 {offsets = [0, 0], sizes = [8, 256], strides = [1, 1]} : vector<8x384xf32> to vector<8x256xf32>
    %c352_i32 = arith.constant 352 : i32
    %10 = tpu.dynamic_rotate %6 by %c352_i32 dim 1 : vector<8x384xf32>, i32 -> vector<8x384xf32>
    %11 = vector.extract_strided_slice %10 {offsets = [0, 0], sizes = [8, 256], strides = [1, 1]} : vector<8x384xf32> to vector<8x256xf32>
    %12 = vector.extract_strided_slice %1 {offsets = [0, 0], sizes = [8, 256], strides = [1, 1]} : vector<8x384xf32> to vector<8x256xf32>
    %c368_i32_5 = arith.constant 368 : i32
    %13 = tpu.dynamic_rotate %1 by %c368_i32_5 dim 1 : vector<8x384xf32>, i32 -> vector<8x384xf32>
    %14 = vector.extract_strided_slice %13 {offsets = [0, 0], sizes = [8, 256], strides = [1, 1]} : vector<8x384xf32> to vector<8x256xf32>
    %c352_i32_6 = arith.constant 352 : i32
    %15 = tpu.dynamic_rotate %1 by %c352_i32_6 dim 1 : vector<8x384xf32>, i32 -> vector<8x384xf32>
    %16 = vector.extract_strided_slice %15 {offsets = [0, 0], sizes = [8, 256], strides = [1, 1]} : vector<8x384xf32> to vector<8x256xf32>
    %c383_i32 = arith.constant 383 : i32
    %17 = tpu.dynamic_rotate %1 by %c383_i32 dim 1 : vector<8x384xf32>, i32 -> vector<8x384xf32>
    %c2 = arith.constant 2 : index
    %c0_7 = arith.constant 0 : index
    %c0_8 = arith.constant 0 : index
    %18 = vector.load %arg3[%c2, %c0_7, %c0_8] : memref<3x1x384xf32, #tpu.memory_space<vmem>>, vector<1x1x384xf32>
    %19 = vector.shape_cast %18 : vector<1x1x384xf32> to vector<1x384xf32>
    %20 = vector.broadcast %19 : vector<1x384xf32> to vector<8x384xf32>
    %21 = arith.mulf %17, %20 : vector<8x384xf32>
    %22 = vector.extract_strided_slice %21 {offsets = [0, 0], sizes = [8, 256], strides = [1, 1]} : vector<8x384xf32> to vector<8x256xf32>
    %c368_i32_9 = arith.constant 368 : i32
    %23 = tpu.dynamic_rotate %21 by %c368_i32_9 dim 1 : vector<8x384xf32>, i32 -> vector<8x384xf32>
    %24 = vector.extract_strided_slice %23 {offsets = [0, 0], sizes = [8, 256], strides = [1, 1]} : vector<8x384xf32> to vector<8x256xf32>
    %c352_i32_10 = arith.constant 352 : i32
    %25 = tpu.dynamic_rotate %21 by %c352_i32_10 dim 1 : vector<8x384xf32>, i32 -> vector<8x384xf32>
    %26 = vector.extract_strided_slice %25 {offsets = [0, 0], sizes = [8, 256], strides = [1, 1]} : vector<8x384xf32> to vector<8x256xf32>
    %27 = tpu.concatenate %7, %9, %11, %12, %14, %16, %22, %24, %26 in 0 : vector<8x256xf32>, vector<8x256xf32>, vector<8x256xf32>, vector<8x256xf32>, vector<8x256xf32>, vector<8x256xf32>, vector<8x256xf32>, vector<8x256xf32>, vector<8x256xf32> -> vector<72x256xf32>
    %c0_11 = arith.constant 0 : index
    %c0_12 = arith.constant 0 : index
    %28 = vector.load %arg2[%c0_11, %c0_12] : memref<16x72xbf16, #tpu.memory_space<vmem>>, vector<16x72xbf16>
    %29 = arith.truncf %27 : vector<72x256xf32> to vector<72x256xbf16>
    %cst = arith.constant dense<0.000000e+00> : vector<16x256xf32>
    %30 = tpu.matmul %28, %29, %cst {dimension_numbers = #tpu.dot_dimension_numbers<[1], [0], [0], [1], [0, 0, 1, 1], [], []>} : vector<16x72xbf16>, vector<72x256xbf16>, vector<16x256xf32> -> vector<16x256xf32>
    %c0_13 = arith.constant 0 : index
    %c0_14 = arith.constant 0 : index
    %31 = vector.load %arg4[%c0_13, %c0_14] : memref<16x1xf32, #tpu.memory_space<vmem>>, vector<16x1xf32>
    %32 = vector.broadcast %31 : vector<16x1xf32> to vector<16x256xf32>
    %33 = arith.addf %30, %32 : vector<16x256xf32>
    %cst_15 = arith.constant 0.000000e+00 : f32
    %34 = vector.broadcast %cst_15 : f32 to vector<16x256xf32>
    %35 = arith.maximumf %33, %34 : vector<16x256xf32>
    %c0_16 = arith.constant 0 : index
    %c0_17 = arith.constant 0 : index
    %c0_18 = arith.constant 0 : index
    %36 = vector.load %arg5[%c0_16, %c0_17, %c0_18] : memref<1x16x256xf32, #tpu.memory_space<vmem>>, vector<1x16x256xf32>
    %37 = vector.shape_cast %36 : vector<1x16x256xf32> to vector<16x256xf32>
    %38 = vector.shape_cast %35 : vector<16x256xf32> to vector<1x16x256xf32>
    tpu.vector_store %arg5[%c0_16, %c0_17, %c0_18], %38 {strides = array<i32>} : memref<1x16x256xf32, #tpu.memory_space<vmem>>, vector<1x16x256xf32>,
    return
  }
  func.func @transform_0(%arg0: i32) -> (i32, i32, i32) {
    %c0_i32 = arith.constant 0 : i32
    %c0_i32_0 = arith.constant 0 : i32
    %c0_i32_1 = arith.constant 0 : i32
    return %arg0, %c0_i32, %c0_i32_0 : i32, i32, i32
  }
  func.func @transform_1(%arg0: i32) -> (i32, i32) {
    %c0_i32 = arith.constant 0 : i32
    %c0_i32_0 = arith.constant 0 : i32
    %c0_i32_1 = arith.constant 0 : i32
    return %c0_i32, %c0_i32_0 : i32, i32
  }
  func.func @transform_2(%arg0: i32) -> (i32, i32, i32) {
    %c0_i32 = arith.constant 0 : i32
    %c0_i32_0 = arith.constant 0 : i32
    %c0_i32_1 = arith.constant 0 : i32
    %c0_i32_2 = arith.constant 0 : i32
    return %c0_i32, %c0_i32_0, %c0_i32_1 : i32, i32, i32
  }
  func.func @transform_3(%arg0: i32) -> (i32, i32) {
    %c0_i32 = arith.constant 0 : i32
    %c0_i32_0 = arith.constant 0 : i32
    %c0_i32_1 = arith.constant 0 : i32
    return %c0_i32, %c0_i32_0 : i32, i32
  }
  func.func @transform_4(%arg0: i32) -> (i32, i32, i32) {
    %c0_i32 = arith.constant 0 : i32
    %c0_i32_0 = arith.constant 0 : i32
    %c0_i32_1 = arith.constant 0 : i32
    return %arg0, %c0_i32, %c0_i32_0 : i32, i32, i32
  }
}

</mosaic_0001>

<bundles_post_ra>
// kernel: tpu_custom_call.1
= control target key start
LH: loop header
LB: loop body
LE: loop exit
PB: predicated region body
PF: predicated region fallthrough
CT: control target
= control target key end

     0   :  { %9 = vsyncpa [#allocation3], 0  ;;  %s925_s0 = inlined_call_operand.hbm [shape: f32[2,8,384], index: 0, kind: input, shape index: {}]   ;;  %s926_s1 = inlined_call_operand.vmem [shape: bf16[16,72], index: 1, kind: input, shape index: {}]   ;;  %s927_s2 = inlined_call_operand.vmem [shape: f32[3,1,384], index: 2, kind: input, shape index: {}]   ;;  %s928_s3 = inlined_call_operand.vmem [shape: f32[16,1], index: 3, kind: input, shape index: {}]   ;;  %s929_s4 = inlined_call_operand.hbm [shape: f32[2,16,256], index: 4, kind: output, shape index: {}]  }
   0x1   :  { %11 = vsyncpa [#allocation3 + $0x1], 0 }
   0x2   :  { %12 = vsyncpa [#allocation4], 0 }
   0x3   :  { %14 = vsyncpa [#allocation4 + $0x1], 0  ;;  %s729_s15 = smov 0   ;;  %s731_s16 = smov 0  }
   0x4   :  { %s733_s17 = smov 0   ;;  %s735_s18 = smov 0  }
   0x5 LB: > { %s750_s19 = sadd.s32 4294967295, %s695_s18   ;;  %s480_s20 = sadd.s32 4294967294, %s695_s18   ;;  %s695_s18 = sphi %s735_s18, %s937_s18   ;;  %s691_s17 = sphi %s733_s17, %s936_s17   ;;  %s687_s16 = sphi %s731_s16, %s935_s16   ;;  %s683_s15 = sphi %s729_s15, %s934_s15  }
   0x6   : > { %s754_s21 = sadd.s32 1, %s695_s18   ;;  %s27_s22 = sadd.s32 1, %s691_s17 }
   0x7   : > { %s24_s23 = ssub.s32 %s695_s18, %s754_s21  ;;  %p34_p0 = scmp.ne.s32.totalorder %s691_s17, %s687_s16 }
   0x8   : > { %p25_p1 = scmp.eq.s32.totalorder %s24_s23, 0  ;;  %p35_p2 = scmp.eq.s32.totalorder %s695_s18, 0 }
   0x9   : > { %p40_p3 = scmp.ne.s32.totalorder %s687_s16, %s683_s15  ;;  %p41_p4 = scmp.eq.s32.totalorder %s750_s19, 0 }
   0xa   : > { %s766_s24 = scalar_select %p25_p1, %s691_s17, %s27_s22  }
   0xb   : > { %p36_p5 = por %p35_p2, %p34_p0  ;;  %p768_p6 = por %p41_p4, %p40_p3 }
   0xc   : > { %p127_p7 = scmp.eq.s32.totalorder %s750_s19, 1  ;;  %p133_p8 = scmp.eq.s32.totalorder %s480_s20, 1 }
   0xd   : > { %p482_p9 = scmp.ge.s32.totalorder %s695_s18, 2  ;;  %p515_p10 = scmp.lt.s32.totalorder %s695_s18, 2 }
   0xe   : > { %p775_p11 = por %p127_p7, %p34_p0  ;;  %p779_p12 = por %p133_p8, %p40_p3 }
   0xf   : > { %s162_s28 = sand.u32 1, %s691_s17   ;;  %s501_s29 = smul.u32 24, %s695_s18 }
  0x10   : > { %s500_s30 = smul.u32 24, %s162_s28  ;;  %p788_p13 = pnand %p515_p10, %p36_p5 }
  0x11   : > { %s171_s7 = scalar_lea.hbm %s925_s0, %s501_s29  ;;  %s163_s12 = scalar_lea.sflag [#allocation3], %s162_s28 }
  0x12   : > { %s173_s9 = sshll.u32 %s171_s7, 4  ;;  %s166_s10 = scalar_lea.vmem [#allocation2], %s500_s30  ;;  %s174_s9 = int_to_ptr.hbm [resolvable:$true] %s173_s9 }
  0x13   : > { %s175_s11 = sshll.u32 %s166_s10, 4  ;;  %s599_s13 = sshra.s32 %s174_s9, 4  ;;  %s176_s11 = int_to_ptr.vmem [resolvable:$true] %s175_s11  ;;  %s600_s13 = int_to_ptr.hbm [resolvable:$true] %s599_s13 }
  0x14   : > { %s601_s14 = scalar_lea.hbm %s600_s13, 24  ;;  %p603_p1 = pneg %p788_p13 }
  0x15   : > { %p602_p0 = scmp.ne.s32.totalorder %s600_s13, %s601_s14  ;;  %s606_s23 = scalar_lea.hbm %s925_s0, 48 }
  0x16   : > { %p607_p4 = scmp.lt.s32.totalorder %s600_s13, %s925_s0  ;;  %p608_p5 = scmp.lt.s32.totalorder %s606_s23, %s601_s14 }
  0x17   : > { %p604_p2 = pnand %p603_p1, %p602_p0 }
  0x18   : > { %p609_p7 = por %p608_p5, %p607_p4 }
  0x19   : > { %p605_p3 = pneg %p604_p2 }
  0x1b   : > { %p610_p8 = pnand %p609_p7, %p605_p3 }
  0x1d   : > { %613 = shalt.err (!%p610_p8)
}
  0x1e   : > { %510 = dma.hbm_to_vmem [thread:$0]  (!%p788_p13), %s174_s9, 384, %s176_s11, %s163_s12  }
  0x1f   : > { %p484_p10 = scmp.ge.s32.totalorder %s695_s18, 1  ;;  %p180_p0 = scmp.lt.s32.totalorder %s695_s18, 3 }
  0x21   : > { %p181_p1 = pnand %p484_p10, %p180_p0 }
  0x22   : > { %s805_s28 = sand.u32 (!%p181_p1), 1, %s687_s16  }
  0x23   : > { %184 = sbr.rel (%p181_p1) target bundleno = 458 (0x1ca), region = 36  ;;  %s187_s6 = scalar_lea.sflag (!%p181_p1), [#allocation3], %s805_s28 }
  0x24   : > { %s502_s30 = smul.u32 (!%p181_p1), 24, %s805_s28 }
  0x26   : > { %s190_s7 = scalar_lea.vmem (!%p181_p1), [#allocation2], %s502_s30 }
  0x28   : > { %674 = dma.done.wait (%p768_p6), %s187_s6, 384  }
  0x29   : > { %676 = vsyncadd (%p768_p6), %s187_s6, 4294966912  ;;  %v219_v0 = vld [vmem:[%s190_s7 + $0x10] sm:$0xff]  ;;  %v813_v1 = vld [vmem:[%s190_s7] sm:$0xff]  ;;  %s697_s8 = smov 127   ;;  %s698_s9 = smov 1   ;;  %v226_v3 = vlaneseq  ;;  %v701_v40 = vmov 0  }
  0x2a   : > { %281 = vrot.lane.b32.xlu1 %v219_v0, %s697_s8  ;;  %277 = vrot.lane.b32.xlu0 %v813_v1, %s697_s8  ;;  %v816_v2 = vld [vmem:[%s190_s7 + $0x8] sm:$0xff]  ;;  %s699_s11 = smov 96   ;;  %s700_s14 = smov 112   ;;  %vm348_vm3 = vcmask 1043456   ;;  %vm344_vm5 = vcmask 588800  }
  0x2b   : > { %222 = vrot.lane.b32.xlu2 %v816_v2, %s698_s9  ;;  %v821_v4 = vand.u32 127, %v226_v3  ;;  %v486_v5 = vld [vmem:[%s927_s2 + $0x6] sm:$0x7]  ;;  %v566_v20 = vpack.i.bf16 %v219_v0, %v816_v2  ;;  %v232_v22 = vld [vmem:[%s927_s2] sm:$0x7]  ;;  %596 = vset.pattern.permute.xlu1 %v701_v40  ;;  %s485_s6 = sshll.u32 %s805_s28, 5 }
  0x2c   : > { %v292_v6 = vperm.slane %v486_v5, 2  ;;  %v290_v13 = vperm.slane %v486_v5, 0  ;;  %v291_v14 = vperm.slane %v486_v5, 1  ;;  %v236_v24 = vperm.slane %v232_v22, 2  ;;  %v327_v37 = vld [vmem:[%s928_s3] sm:$0xff]  ;;  %v328_v38 = vld [vmem:[%s928_s3 + $0x8] sm:$0xff]  ;;  %597 = vset.pattern.permute.xlu2 %v701_v40  ;;  %598 = vset.pattern.permute.xlu0 %v701_v40 }
  0x2d   : > { %vm283_vm0 = vcmp.lt.s32.totalorder %v821_v4, 127  ;;  %vm228_vm1 = vcmp.lt.s32.totalorder %v821_v4, 1  ;;  %v234_v28 = vperm.slane %v232_v22, 0  ;;  %v235_v29 = vperm.slane %v232_v22, 1  ;;  %s499_s7 = sshll.u32 %s750_s19, 5  ;;  %s392_s19 = scalar_lea.sflag [#allocation4], %s805_s28 }
  0x2e   : > { %vm258_vm2 = vcmp.lt.s32.totalorder %v821_v4, 96  ;;  %vm249_vm4 = vcmp.lt.s32.totalorder %v821_v4, 112  ;;  %s403_s10 = scalar_lea.hbm %s929_s4, %s499_s7  ;;  %s649_s23 = scalar_lea.hbm %s929_s4, 64 }
  0x2f   : > { %s406_s12 = sshll.u32 %s403_s10, 4  ;;  %s407_s12 = int_to_ptr.hbm [resolvable:$true] %s406_s12 }
  0x30   : > { %s643_s13 = sshra.s32 %s407_s12, 4  ;;  %s644_s13 = int_to_ptr.hbm [resolvable:$true] %s643_s13 }
  0x31   : > { %p650_p3 = scmp.lt.s32.totalorder %s644_s13, %s929_s4 }
  0x32   : > { %279 = vrot.lane.b32.xlu0 %v816_v2, %s697_s8  ;;  %220 = vrot.lane.b32.xlu1 %v813_v1, %s698_s9  ;;  %s215_s8 = scalar_lea.vmem [#allocation5], %s485_s6 }
  0x33   : > { %224 = vrot.lane.b32.xlu2 %v219_v0, %s698_s9 }
  0x85   : > { %v223_v12 = vpop.permute.xlu2 %222 }
  0x8d   : > { %v225_v23 = vpop.permute.xlu2 %224 }
  0x8e   : > { %v229_v25 = vsel %vm228_vm1, %v223_v12, %v225_v23 }
  0x8f   : > { %v242_v27 = vmul.f32 %v236_v24, %v229_v25 }
  0x9c   : > { %v282_v7 = vpop.permute.xlu1 %281  ;;  %v278_v8 = vpop.permute.xlu0 %277 }
  0x9d   : > { %v286_v9 = vsel %vm283_vm0, %v282_v7, %v278_v8 }
  0x9e   : > { %v298_v10 = vmul.f32 %v292_v6, %v286_v9 }
  0xa0   : > { %v561_v11 = vpack.i.bf16 %v813_v1, %v298_v10 }
  0xa2   : > { %562 = vrot.lane.b32.xlu1 %v561_v11, %s699_s11 }
  0xa4   : > { %v280_v15 = vpop.permute.xlu0 %279  ;;  %v221_v26 = vpop.permute.xlu1 %220 }
  0xa5   : > { %v284_v16 = vsel %vm283_vm0, %v280_v15, %v282_v7  ;;  %v285_v17 = vsel %vm283_vm0, %v278_v8, %v280_v15  ;;  %v230_v30 = vsel %vm228_vm1, %v221_v26, %v223_v12  ;;  %v231_v31 = vsel %vm228_vm1, %v225_v23, %v221_v26  ;;  %v498_v26 = vld [vmem:[%s926_s1] sm:$0xff] }
  0xa6   : > { %v829_v18 = vmul.f32 %v290_v13, %v285_v17  ;;  %v831_v19 = vmul.f32 %v291_v14, %v284_v16  ;;  %v843_v32 = vmul.f32 %v234_v28, %v231_v31  ;;  %v845_v33 = vmul.f32 %v235_v29, %v230_v30 }
  0xa8   : > { %v571_v21 = vpack.i.bf16 %v831_v19, %v829_v18  ;;  %v591_v34 = vpack.i.bf16 %v845_v33, %v843_v32 }
  0xaa   : > { %567 = vrot.lane.b32.xlu1 %v566_v20, %s700_s14  ;;  %572 = vrot.lane.b32.xlu2 %v571_v21, %s700_s14 }
  0xab   : > { %557 = vrot.lane.b32.xlu0 %v571_v21, %s699_s11 }
  0xb2   : > { %256 = vrot.lane.b32.xlu1 %v242_v27, %s699_s11  ;;  %577 = vrot.lane.b32.xlu2 %v566_v20, %s699_s11 }
  0xb3   : > { %582 = vrot.lane.b32.xlu0 %v561_v11, %s700_s14 }
  0xba   : > { %592 = vrot.lane.b32.xlu2 %v591_v34, %s700_s14  ;;  %331 = vperm.xlu1 %596, %v327_v37  }
  0xbb   : > { %587 = vrot.lane.b32.xlu0 %v591_v34, %s699_s11  ;;  %s404_s11 = sshll.u32 %s215_s8, 4  ;;  %s405_s11 = int_to_ptr.vmem [resolvable:$true] %s404_s11 }
  0xc2   : > { %336 = vperm.xlu2 %597, %v328_v38  }
  0xc3   : > { %247 = vrot.lane.b32.xlu0 %v242_v27, %s700_s14  ;;  %s645_s14 = scalar_lea.hbm %s644_s13, 32 }
  0xc4   : > { %p646_p6 = scmp.ne.s32.totalorder %s644_s13, %s645_s14  ;;  %p651_p4 = scmp.lt.s32.totalorder %s649_s23, %s645_s14 }
  0xc6   : > { %p647_p13 = pnand %p646_p6, %p775_p11  ;;  %p652_p5 = por %p651_p4, %p650_p3 }
  0xc8   : > { %p648_p2 = pneg %p647_p13 }
  0xca   : > { %p653_p7 = pnand %p652_p5, %p648_p2 }
 0x104   : > { %v573_v35 = vpop.permute.xlu2 %572 }
 0x105   : > { %v575_v44 = vunpack.i.h.bf16 %v573_v35  ;;  %v574_v45 = vunpack.i.l.bf16 %v573_v35 }
 0x107   : > { %v306_v55 = vsel %vm249_vm4, %v574_v45, %v575_v44 }
 0x108   : > { %v323_v63 = vpack.c.bf16 %v306_v55, %v829_v18 }
 0x10c   : > { %v578_v48 = vpop.permute.xlu2 %577 }
 0x10d   : > { %v580_v51 = vunpack.i.h.bf16 %v578_v48  ;;  %v579_v56 = vunpack.i.l.bf16 %v578_v48 }
 0x10f   : > { %v275_v0 = vsel %vm258_vm2, %v579_v56, %v580_v51 }
 0x114   : > { %v563_v36 = vpop.permute.xlu1 %562  ;;  %v593_v10 = vpop.permute.xlu2 %592 }
 0x115   : > { %v564_v41 = vunpack.i.l.bf16 %v563_v36  ;;  %v565_v57 = vunpack.i.h.bf16 %v563_v36  ;;  %v595_v13 = vunpack.i.h.bf16 %v593_v10  ;;  %v594_v14 = vunpack.i.l.bf16 %v593_v10 }
 0x117   : > { %v276_v6 = vsel %vm258_vm2, %v565_v57, %v579_v56  ;;  %v251_v22 = vsel %vm249_vm4, %v594_v14, %v595_v13 }
 0x118   : > { %v317_v24 = vpack.c.bf16 %v251_v22, %v843_v32 }
 0x11c   : > { %v568_v52 = vpop.permute.xlu1 %567  ;;  %v337_v32 = vpop.permute.xlu2 %336 }
 0x11d   : > { %v558_v39 = vpop.permute.xlu0 %557  ;;  %v570_v58 = vunpack.i.h.bf16 %v568_v52  ;;  %v569_v59 = vunpack.i.l.bf16 %v568_v52 }
 0x11e   : > { %v560_v42 = vunpack.i.h.bf16 %v558_v39  ;;  %v559_v43 = vunpack.i.l.bf16 %v558_v39 }
 0x11f   : > { %v267_v7 = vsel %vm249_vm4, %v569_v59, %v570_v58 }
 0x120   : > { %v314_v46 = vsel %vm258_vm2, %v559_v43, %v560_v42  ;;  %v313_v47 = vsel %vm258_vm2, %v560_v42, %v564_v41  ;;  %v322_v11 = vpack.c.bf16 %v275_v0, %v267_v7 }
 0x121   : > { %v325_v49 = vpack.c.bf16 %v314_v46, %v314_v46  ;;  %v326_v50 = vpack.c.bf16 %v313_v47, %v313_v47 }
 0x123   : > { %v350_v53 = vsel %vm348_vm3, %v325_v49, 0  ;;  %v353_v54 = vsel %vm348_vm3, %v326_v50, 0 }
 0x124   : > { %358 = vmatpush.bf16.msra.mxu0 %v350_v53  ;;  %372 = vmatpush.bf16.msra.mxu1 %v353_v54  ;;  %v257_v17 = vpop.permute.xlu1 %256 }
 0x125   : > { %v583_v60 = vpop.permute.xlu0 %582 }
 0x126   : > { %v585_v61 = vunpack.i.h.bf16 %v583_v60  ;;  %v584_v62 = vunpack.i.l.bf16 %v583_v60 }
 0x128   : > { %359 = vmatpush.bf16.msra.mxu0 %v323_v63  ;;  %v305_v3 = vsel %vm249_vm4, %v575_v44, %v584_v62  ;;  %v268_v5 = vsel %vm249_vm4, %v585_v61, %v569_v59 }
 0x129   : > { %v324_v8 = vpack.c.bf16 %v305_v3, %v831_v19  ;;  %v321_v9 = vpack.c.bf16 %v276_v6, %v268_v5 }
 0x12b   : > { %373 = vmatpush.bf16.msra.mxu1 %v324_v8 }
 0x12c   : > { %360 = vmatpush.bf16.msra.mxu0 %v321_v9 }
 0x12d   : > { %v588_v12 = vpop.permute.xlu0 %587 }
 0x12e   : > { %v590_v15 = vunpack.i.h.bf16 %v588_v12  ;;  %v589_v16 = vunpack.i.l.bf16 %v588_v12 }
 0x12f   : > { %374 = vmatpush.bf16.msra.mxu1 %v322_v11 }
 0x130   : > { %v260_v18 = vsel %vm258_vm2, %v589_v16, %v590_v15  ;;  %v259_v20 = vsel %vm258_vm2, %v590_v15, %v257_v17 }
 0x131   : > { %v319_v19 = vpack.c.bf16 %v813_v1, %v260_v18  ;;  %v320_v21 = vpack.c.bf16 %v816_v2, %v259_v20  ;;  %v332_v2 = vpop.permute.xlu1 %331 }
 0x133   : > { %361 = vmatpush.bf16.msra.mxu0 %v319_v19  ;;  %375 = vmatpush.bf16.msra.mxu1 %v320_v21 }
 0x135   : > { %v248_v23 = vpop.permute.xlu0 %247 }
 0x136   : > { %v250_v25 = vsel %vm249_vm4, %v595_v13, %v248_v23 }
 0x137   : > { %362 = vmatpush.bf16.msra.mxu0 %v317_v24  ;;  %v318_v1 = vpack.c.bf16 %v250_v25, %v845_v33 }
 0x139   : > { %376 = vmatpush.bf16.msra.mxu1 %v318_v1 }
 0x13a   : > { %491 = vmatmul.msk.bf16.vlgmr.msra.gmra.mxu0 %vm344_vm5, %v498_v26 }
 0x13c   : > { %492 = vmatmul.msk.bf16.vlgmr.msra.gmra.mxu1 %vm344_vm5, %v498_v26 }
 0x1b7   : > { %v364_v27 = vpop.f32.mrf.mxu0 }
 0x1b8   : > { %v365_v28 = vadd.f32 %v364_v27, %v332_v2 }
 0x1b9   : > { %v378_v29 = vpop.f32.mrf.mxu1 }
 0x1ba   : > { %v383_v30 = vmax.f32 %v365_v28, 0.0  ;;  %v379_v4 = vadd.f32 %v378_v29, %v332_v2 }
 0x1bc   : > { %387 = vst [vmem:[%s215_s8] sm:$0xff] %v383_v30  ;;  %v384_v31 = vmax.f32 %v379_v4, 0.0 }
 0x1be   : > { %388 = vst [vmem:[%s215_s8 + $0x8] sm:$0xff] %v384_v31 }
 0x1bf   : > { %v366_v33 = vpop.f32.mrf.mxu0 }
 0x1c0   : > { %v367_v34 = vadd.f32 %v366_v33, %v337_v32 }
 0x1c1   : > { %v380_v35 = vpop.f32.mrf.mxu1 }
 0x1c2   : > { %v385_v36 = vmax.f32 %v367_v34, 0.0  ;;  %v381_v37 = vadd.f32 %v380_v35, %v337_v32 }
 0x1c4   : > { %389 = vst [vmem:[%s215_s8 + $0x10] sm:$0xff] %v385_v36  ;;  %v386_v38 = vmax.f32 %v381_v37, 0.0 }
 0x1c6   : > { %390 = vst [vmem:[%s215_s8 + $0x18] sm:$0xff] %v386_v38 }
 0x1c7   : > { %656 = shalt.err (!%p653_p7)
}
 0x1c8   : > { %s702_s28 = smov 256   ;;  %s703_s30 = smov 16  }
 0x1c9   : > { %505 = dma.vmem_to_hbm [thread:$0]  (%p775_p11), %s405_s11, 512, %s407_s12, %s392_s19, %s702_s28, %s702_s28, %s703_s30  }
 0x1ca PF: > { %s421_s6 = sand.u32 1, %s683_s15   ;;  %p512_p8 = pnand %p482_p9, %p779_p12 }
 0x1cb   : > { %s422_s7 = scalar_lea.sflag [#allocation4], %s421_s6 }
 0x1cc   : > { %p513_p10 = pneg %p512_p8 }
 0x1ce   : > { %678 = dma.done.wait (%p513_p10), %s422_s7, 512  }
 0x1cf   : > { %680 = vsyncadd (%p513_p10), %s422_s7, 4294966784  ;;  %p17_p0 = scmp.ge.s32.totalorder %s754_s21, 4   ;;  %s934_s15 = smov %s687_s16 }
 0x1d0   : > { %s935_s16 = smov %s691_s17  ;;  %s936_s17 = smov %s766_s24 }
 0x1d1   : > { %s937_s18 = smov %s754_s21  ;;  %19 = sbr.rel (!%p17_p0) target bundleno = 5 (0x5), region = 82 }
 0x1d6   :  { %428 = vsyncpa [#allocation3], 1 }
 0x1d7   :  { %430 = vsyncpa [#allocation3 + $0x1], 1 }
 0x1d8   :  { %431 = vsyncpa [#allocation4], 1 }
 0x1d9   :  { %433 = vsyncpa [#allocation4 + $0x1], 1 }

</bundles_post_ra>
